<compile_context>
chip_gen: v5e
topology: v5e:2x2
jax: 0.10.0
libtpu: 0.0.40
codegen_flags: <defaults>
</compile_context>

<pallas_src>
import functools

import jax
import jax.numpy as jnp
from jax.experimental import pallas as pl
from jax.experimental.pallas import tpu as pltpu

LANES = 128
SUBLANES = 8
CHUNK = SUBLANES * LANES          # main/tail split granularity (1024 elements)
MAX_TILE_ROWS = 8192              # (8192, 128) f32 block = 4 MiB / input / step
VMEM_BUDGET = 48 * 1024 * 1024    # fits v7x's 64 MiB physical VMEM w/ headroom


@functools.lru_cache(maxsize=1)
def _tensorcores_per_device():
    # Only v7x exposes two TensorCores per chip; v5e / v6e have one.  If the
    # device kind cannot be identified, fall back to the safe single-TC path.
    try:
        kind = jax.devices()[0].device_kind.lower()
    except Exception:
        return 1
    return 2 if "v7" in kind else 1


def _bce_sum_kernel(p_ref, t_ref, o_ref, acc_ref, *, rows_valid, tile_rows,
                    tiles_per_part):
    c = pl.program_id(0)      # partial-sum / core index ("parallel")
    i = pl.program_id(1)      # reduction step ("arbitrary")

    @pl.when(i == 0)
    def _():
        acc_ref[...] = jnp.zeros_like(acc_ref)

    p = p_ref[...].astype(jnp.float32)
    t = t_ref[...].astype(jnp.float32)
    # torch.nn.functional.binary_cross_entropy clamps the log terms at -100.
    # Both logs kept so soft (non-binary) targets remain exact.
    log_p = jnp.maximum(jnp.log(p), -100.0)
    log_1mp = jnp.maximum(jnp.log(1.0 - p), -100.0)
    bce = -(t * log_p + (1.0 - t) * log_1mp)

    block_idx = c * tiles_per_part + i
    is_full = (block_idx + 1) * tile_rows <= rows_valid

    # Fast path: interior blocks need no masking at all (pure VPU adds).
    @pl.when(is_full)
    def _():
        acc_ref[...] += bce.reshape(-1, SUBLANES, LANES).sum(axis=0)

    # Slow path: the single partial last block and any clamped duplicate block
    # (rem_rows <= 0) are masked row-wise.  jnp.where discards any NaN/Inf the
    # unspecified out-of-bounds rows may have produced.
    @pl.when(jnp.logical_not(is_full))
    def _():
        rem_rows = rows_valid - block_idx * tile_rows
        row_ids = jax.lax.broadcasted_iota(jnp.int32, (tile_rows, LANES), 0)
        masked = jnp.where(row_ids < rem_rows, bce, 0.0)
        acc_ref[...] += masked.reshape(-1, SUBLANES, LANES).sum(axis=0)

    @pl.when(i == pl.num_programs(1) - 1)
    def _():
        o_ref[0, 0] = jnp.sum(acc_ref[...])


def _bce_sum_plain(p, t):
    # Plain-JAX BCE sum for the <1024-element tail (and tiny inputs).
    p = p.astype(jnp.float32)
    t = t.astype(jnp.float32)
    log_p = jnp.maximum(jnp.log(p), -100.0)
    log_1mp = jnp.maximum(jnp.log(1.0 - p), -100.0)
    return jnp.sum(-(t * log_p + (1.0 - t) * log_1mp))


def _bce_sum_kernel_call(p2, t2, rows):
    """Run the Pallas reduction over a (rows, 128) view; returns partial sums."""
    itemsize_p = jnp.dtype(p2.dtype).itemsize
    itemsize_t = jnp.dtype(t2.dtype).itemsize

    # VMEM footprint per row: double-buffered input blocks + worst-case f32
    # elementwise temporaries inside the body.
    bytes_per_row = 2 * LANES * (itemsize_p + itemsize_t) + 6 * LANES * 4
    budget_rows = max(SUBLANES, (VMEM_BUDGET // bytes_per_row) // SUBLANES * SUBLANES)
    tile_rows = min(MAX_TILE_ROWS, rows, budget_rows)     # multiple of 8

    nblocks = pl.cdiv(rows, tile_rows)
    num_parts = _tensorcores_per_device() if nblocks >= 2 else 1
    tiles_per_part = pl.cdiv(nblocks, num_parts)

    # Clamp the block index so no DMA ever goes out of bounds; clamped
    # (duplicate) blocks are fully masked in the kernel (rem_rows <= 0).
    def idx_map(c, i):
        return (jnp.minimum(c * tiles_per_part + i, nblocks - 1), 0)

    kernel = functools.partial(
        _bce_sum_kernel,
        rows_valid=rows,
        tile_rows=tile_rows,
        tiles_per_part=tiles_per_part,
    )

    n_main = rows * LANES
    cost = pl.CostEstimate(
        flops=8 * n_main,
        transcendentals=2 * n_main,
        bytes_accessed=n_main * (itemsize_p + itemsize_t) + num_parts * 4,
    )
    vmem_limit = int(min(
        56 * 1024 * 1024,
        max(16 * 1024 * 1024, bytes_per_row * tile_rows + 2 * 1024 * 1024),
    ))

    # TODO(synk): on v7x, verify in a profile that the leading "parallel" axis
    # actually shards across both TensorCores; if not, switch it to
    # pltpu.CORE_PARALLEL (or restructure with pl.core_map).
    return pl.pallas_call(
        kernel,
        out_shape=jax.ShapeDtypeStruct((num_parts, 1), jnp.float32),
        grid_spec=pltpu.PrefetchScalarGridSpec(
            num_scalar_prefetch=0,
            grid=(num_parts, tiles_per_part),
            in_specs=[
                pl.BlockSpec((tile_rows, LANES), idx_map),
                pl.BlockSpec((tile_rows, LANES), idx_map),
            ],
            out_specs=pl.BlockSpec(
                (1, 1), lambda c, i: (c, 0),
                memory_space=pltpu.MemorySpace.SMEM,
            ),
            scratch_shapes=[pltpu.VMEM((SUBLANES, LANES), jnp.float32)],
        ),
        compiler_params=pltpu.CompilerParams(
            dimension_semantics=("parallel", "arbitrary"),
            vmem_limit_bytes=vmem_limit,
        ),
        cost_estimate=cost,
    )(p2, t2)


@functools.partial(jax.jit, static_argnames=("alpha", "gamma"))
def focal_loss(inputs, targets, alpha=0.8, gamma=2):
    # Flatten (mirrors inputs.view(-1) / targets.view(-1)); keep native dtype.
    p_flat = inputs.reshape(-1)
    t_flat = targets.reshape(-1)
    n = p_flat.shape[0]

    # Main part: largest multiple of 1024 elements -> zero-copy (rows, 128)
    # view with rows a multiple of 8.  Tail (<1024 elements) done in glue.
    n_main = (n // CHUNK) * CHUNK

    total = jnp.float32(0.0)
    if n_main:
        rows = n_main // LANES
        if n_main == n:
            p2 = p_flat.reshape(rows, LANES)
            t2 = t_flat.reshape(rows, LANES)
        else:
            p2 = p_flat[:n_main].reshape(rows, LANES)
            t2 = t_flat[:n_main].reshape(rows, LANES)
        partials = _bce_sum_kernel_call(p2, t2, rows)
        total = total + jnp.sum(partials)
    if n_main != n:
        total = total + _bce_sum_plain(p_flat[n_main:], t_flat[n_main:])

    # Scalar glue: mean reduction + focal weighting (matches the PyTorch ref).
    bce = total / jnp.float32(n)
    bce_exp = jnp.exp(-bce)
    return alpha * (1.0 - bce_exp) ** gamma * bce


def _reference_focal_loss(inputs, targets, alpha=0.8, gamma=2):
    p = inputs.reshape(-1).astype(jnp.float32)
    t = targets.reshape(-1).astype(jnp.float32)
    log_p = jnp.maximum(jnp.log(p), -100.0)
    log_1mp = jnp.maximum(jnp.log(1.0 - p), -100.0)
    bce = jnp.mean(-(t * log_p + (1.0 - t) * log_1mp))
    bce_exp = jnp.exp(-bce)
    return alpha * (1.0 - bce_exp) ** gamma * bce


if __name__ == "__main__":
    key = jax.random.PRNGKey(0)
    keys = jax.random.split(key, 8)

    # Segmentation-style shape: (N, C, H, W); n = 2048 -> pure zero-copy path.
    shape = (2, 4, 16, 16)
    inputs = jax.nn.sigmoid(jax.random.normal(keys[0], shape, dtype=jnp.float32))
    targets = (jax.random.uniform(keys[1], shape) > 0.5).astype(jnp.float32)
    out = jax.block_until_ready(focal_loss(inputs, targets))
    ref = _reference_focal_loss(inputs, targets)
    assert jnp.allclose(out, ref, rtol=1e-4, atol=1e-6), (out, ref)

    # Ragged size (n = 1215): kernel handles the first 1024 elements, the
    # 191-element tail is summed in the JAX glue.
    shape2 = (3, 5, 9, 9)
    inputs2 = jax.nn.sigmoid(jax.random.normal(keys[2], shape2, dtype=jnp.float32))
    targets2 = (jax.random.uniform(keys[3], shape2) > 0.5).astype(jnp.float32)
    out2 = jax.block_until_ready(focal_loss(inputs2, targets2))
    ref2 = _reference_focal_loss(inputs2, targets2)
    assert jnp.allclose(out2, ref2, rtol=1e-4, atol=1e-6), (out2, ref2)

    # Tiny ragged size (n = 945 < 1024): pure-glue fallback path.
    shape3 = (3, 5, 7, 9)
    inputs3 = jax.nn.sigmoid(jax.random.normal(keys[4], shape3, dtype=jnp.float32))
    targets3 = (jax.random.uniform(keys[5], shape3) > 0.5).astype(jnp.float32)
    out3 = jax.block_until_ready(focal_loss(inputs3, targets3))
    ref3 = _reference_focal_loss(inputs3, targets3)
    assert jnp.allclose(out3, ref3, rtol=1e-4, atol=1e-6), (out3, ref3)

    # Medium multi-block ragged size (n = 1,081,600): exercises the multi-step
    # grid, the large-tile VMEM footprint, and the masked partial last block.
    shape4 = (2, 2, 520, 520)
    inputs4 = jax.nn.sigmoid(jax.random.normal(keys[6], shape4, dtype=jnp.float32))
    targets4 = (jax.random.uniform(keys[7], shape4) > 0.5).astype(jnp.float32)
    out4 = jax.block_until_ready(focal_loss(inputs4, targets4))
    ref4 = _reference_focal_loss(inputs4, targets4)
    assert jnp.allclose(out4, ref4, rtol=1e-3, atol=1e-6), (out4, ref4)

    print("KERNEL_OK")
</pallas_src>

<mosaic_0001>
module attributes {stable_mosaic.version = 11 : i64} {
  func.func @_bce_sum_kernel(%arg0: i32, %arg1: i32, %arg2: memref<16x128xf32, #tpu.memory_space<vmem>>, %arg3: memref<16x128xf32, #tpu.memory_space<vmem>>, %arg4: memref<1x1xf32, #tpu.memory_space<smem>>, %arg5: memref<8x128xf32, #tpu.memory_space<vmem>>) attributes {dimension_semantics = [#tpu.dimension_semantics<parallel>, #tpu.dimension_semantics<arbitrary>], iteration_bounds = array<i64: 1, 1>, scalar_prefetch = 0 : i64, scratch_operands = 1 : i64, tpu.core_type = #tpu.core_type<tc>, window_params = [{transform_indices = @transform_0, window_bounds = array<i64: 16, 128>}, {transform_indices = @transform_1, window_bounds = array<i64: 16, 128>}, {transform_indices = @transform_2, window_bounds = array<i64: 1, 1>}]} {
    %c0_i32 = arith.constant 0 : i32
    %0 = arith.cmpi eq, %arg1, %c0_i32 : i32
    %1 = arith.extui %0 : i1 to i32
    %c0_i32_0 = arith.constant 0 : i32
    %2 = arith.cmpi ne, %1, %c0_i32_0 : i32
    scf.if %2 {
      %cst_14 = arith.constant 0.000000e+00 : f32
      %33 = vector.broadcast %cst_14 : f32 to vector<8x128xf32>
      %c0_15 = arith.constant 0 : index
      %c0_16 = arith.constant 0 : index
      %34 = vector.load %arg5[%c0_15, %c0_16] : memref<8x128xf32, #tpu.memory_space<vmem>>, vector<8x128xf32>
      tpu.vector_store %arg5[%c0_15, %c0_16], %33 {strides = array<i32>} : memref<8x128xf32, #tpu.memory_space<vmem>>, vector<8x128xf32>,
    } else {
    }
    %c0 = arith.constant 0 : index
    %c0_1 = arith.constant 0 : index
    %3 = vector.load %arg2[%c0, %c0_1] : memref<16x128xf32, #tpu.memory_space<vmem>>, vector<16x128xf32>
    %c0_2 = arith.constant 0 : index
    %c0_3 = arith.constant 0 : index
    %4 = vector.load %arg3[%c0_2, %c0_3] : memref<16x128xf32, #tpu.memory_space<vmem>>, vector<16x128xf32>
    %5 = math.log %3 : vector<16x128xf32>
    %cst = arith.constant -1.000000e+02 : f32
    %6 = vector.broadcast %cst : f32 to vector<16x128xf32>
    %7 = arith.maximumf %5, %6 : vector<16x128xf32>
    %cst_4 = arith.constant 1.000000e+00 : f32
    %8 = vector.broadcast %cst_4 : f32 to vector<16x128xf32>
    %9 = arith.subf %8, %3 : vector<16x128xf32>
    %10 = math.log %9 : vector<16x128xf32>
    %cst_5 = arith.constant -1.000000e+02 : f32
    %11 = vector.broadcast %cst_5 : f32 to vector<16x128xf32>
    %12 = arith.maximumf %10, %11 : vector<16x128xf32>
    %13 = arith.mulf %4, %7 : vector<16x128xf32>
    %cst_6 = arith.constant 1.000000e+00 : f32
    %14 = vector.broadcast %cst_6 : f32 to vector<16x128xf32>
    %15 = arith.subf %14, %4 : vector<16x128xf32>
    %16 = arith.mulf %15, %12 : vector<16x128xf32>
    %17 = arith.addf %13, %16 : vector<16x128xf32>
    %cst_7 = arith.constant 0.000000e+00 : f32
    %18 = vector.broadcast %cst_7 : f32 to vector<16x128xf32>
    %19 = arith.subf %18, %17 : vector<16x128xf32>
    %c1_i32 = arith.constant 1 : i32
    %20 = arith.muli %arg0, %c1_i32 : i32
    %21 = arith.addi %20, %arg1 : i32
    %c1_i32_8 = arith.constant 1 : i32
    %22 = arith.addi %21, %c1_i32_8 : i32
    %c16_i32 = arith.constant 16 : i32
    %23 = arith.muli %22, %c16_i32 : i32
    %c16_i32_9 = arith.constant 16 : i32
    %24 = arith.cmpi sle, %23, %c16_i32_9 : i32
    %25 = arith.extui %24 : i1 to i32
    %c0_i32_10 = arith.constant 0 : i32
    %26 = arith.cmpi ne, %25, %c0_i32_10 : i32
    scf.if %26 {
      %c0_14 = arith.constant 0 : index
      %c0_15 = arith.constant 0 : index
      %33 = vector.load %arg5[%c0_14, %c0_15] : memref<8x128xf32, #tpu.memory_space<vmem>>, vector<8x128xf32>
      %34 = vector.shape_cast %19 : vector<16x128xf32> to vector<2x8x128xf32>
      %cst_16 = arith.constant dense<0.000000e+00> : vector<8x128xf32>
      %35 = vector.multi_reduction <add>, %34, %cst_16 [0] : vector<2x8x128xf32> to vector<8x128xf32>
      %36 = arith.addf %33, %35 : vector<8x128xf32>
      %c0_17 = arith.constant 0 : index
      %c0_18 = arith.constant 0 : index
      %37 = vector.load %arg5[%c0_17, %c0_18] : memref<8x128xf32, #tpu.memory_space<vmem>>, vector<8x128xf32>
      tpu.vector_store %arg5[%c0_17, %c0_18], %36 {strides = array<i32>} : memref<8x128xf32, #tpu.memory_space<vmem>>, vector<8x128xf32>,
    } else {
    }
    %true = arith.constant true
    %27 = arith.xori %24, %true : i1
    %28 = arith.extui %27 : i1 to i32
    %c0_i32_11 = arith.constant 0 : i32
    %29 = arith.cmpi ne, %28, %c0_i32_11 : i32
    scf.if %29 {
      %c16_i32_14 = arith.constant 16 : i32
      %33 = arith.muli %21, %c16_i32_14 : i32
      %c16_i32_15 = arith.constant 16 : i32
      %34 = arith.subi %c16_i32_15, %33 : i32
      %35 = tpu.iota {dimensions = array<i32: 0>} : vector<16x128xi32>
      %36 = vector.broadcast %34 : i32 to vector<16x128xi32>
      %37 = arith.cmpi slt, %35, %36 : vector<16x128xi32>
      %cst_16 = arith.constant 0.000000e+00 : f32
      %38 = vector.broadcast %cst_16 : f32 to vector<16x128xf32>
      %39 = arith.select %37, %19, %38 : vector<16x128xi1>, vector<16x128xf32>
      %c0_17 = arith.constant 0 : index
      %c0_18 = arith.constant 0 : index
      %40 = vector.load %arg5[%c0_17, %c0_18] : memref<8x128xf32, #tpu.memory_space<vmem>>, vector<8x128xf32>
      %41 = vector.shape_cast %39 : vector<16x128xf32> to vector<2x8x128xf32>
      %cst_19 = arith.constant dense<0.000000e+00> : vector<8x128xf32>
      %42 = vector.multi_reduction <add>, %41, %cst_19 [0] : vector<2x8x128xf32> to vector<8x128xf32>
      %43 = arith.addf %40, %42 : vector<8x128xf32>
      %c0_20 = arith.constant 0 : index
      %c0_21 = arith.constant 0 : index
      %44 = vector.load %arg5[%c0_20, %c0_21] : memref<8x128xf32, #tpu.memory_space<vmem>>, vector<8x128xf32>
      tpu.vector_store %arg5[%c0_20, %c0_21], %43 {strides = array<i32>} : memref<8x128xf32, #tpu.memory_space<vmem>>, vector<8x128xf32>,
    } else {
    }
    %c0_i32_12 = arith.constant 0 : i32
    %30 = arith.cmpi eq, %arg1, %c0_i32_12 : i32
    %31 = arith.extui %30 : i1 to i32
    %c0_i32_13 = arith.constant 0 : i32
    %32 = arith.cmpi ne, %31, %c0_i32_13 : i32
    scf.if %32 {
      %c0_14 = arith.constant 0 : index
      %c0_15 = arith.constant 0 : index
      %33 = vector.load %arg5[%c0_14, %c0_15] : memref<8x128xf32, #tpu.memory_space<vmem>>, vector<8x128xf32>
      %34 = vector.shape_cast %33 : vector<8x128xf32> to vector<1x8x128xf32>
      %cst_16 = arith.constant dense<0.000000e+00> : vector<1xf32>
      %35 = vector.multi_reduction <add>, %34, %cst_16 [1, 2] : vector<1x8x128xf32> to vector<1xf32>
      %36 = vector.shape_cast %35 : vector<1xf32> to vector<1x1x1xf32>
      %37 = vector.extract %36[0, 0, 0] : f32 from vector<1x1x1xf32>
      %c0_17 = arith.constant 0 : index
      %c0_18 = arith.constant 0 : index
      %38 = memref.load %arg4[%c0_17, %c0_18] : memref<1x1xf32, #tpu.memory_space<smem>>
      memref.store %37, %arg4[%c0_17, %c0_18] : memref<1x1xf32, #tpu.memory_space<smem>>
    } else {
    }
    return
  }
  func.func @transform_0(%arg0: i32, %arg1: i32) -> (i32, i32) {
    %c1_i32 = arith.constant 1 : i32
    %0 = arith.muli %arg0, %c1_i32 : i32
    %1 = arith.addi %0, %arg1 : i32
    %c0_i32 = arith.constant 0 : i32
    %2 = arith.minsi %1, %c0_i32 : i32
    %c0_i32_0 = arith.constant 0 : i32
    %c0_i32_1 = arith.constant 0 : i32
    return %2, %c0_i32_0 : i32, i32
  }
  func.func @transform_1(%arg0: i32, %arg1: i32) -> (i32, i32) {
    %c1_i32 = arith.constant 1 : i32
    %0 = arith.muli %arg0, %c1_i32 : i32
    %1 = arith.addi %0, %arg1 : i32
    %c0_i32 = arith.constant 0 : i32
    %2 = arith.minsi %1, %c0_i32 : i32
    %c0_i32_0 = arith.constant 0 : i32
    %c0_i32_1 = arith.constant 0 : i32
    return %2, %c0_i32_0 : i32, i32
  }
  func.func @transform_2(%arg0: i32, %arg1: i32) -> (i32, i32) {
    %c0_i32 = arith.constant 0 : i32
    %c0_i32_0 = arith.constant 0 : i32
    return %arg0, %c0_i32 : i32, i32
  }
}

</mosaic_0001>

<bundles_post_ra>
// kernel: focal_loss.1
= control target key start
LH: loop header
LB: loop body
LE: loop exit
PB: predicated region body
PF: predicated region fallthrough
CT: control target
= control target key end

     0   :  { %s236_s0 = inlined_call_operand.vmem [shape: f32[16,128], index: 0, kind: input, shape index: {}]   ;;  %s237_s1 = inlined_call_operand.vmem [shape: f32[16,128], index: 1, kind: input, shape index: {}]   ;;  %s238_s2 = inlined_call_operand.hbm [shape: f32[1,1], index: 2, kind: output, shape index: {}]  }
   0x1   :  { %v81_v0 = vld [vmem:[%s236_s0] sm:$0xff]  ;;  %v82_v1 = vld [vmem:[%s236_s0 + $0x8] sm:$0xff] }
   0x2   :  { %183 = vlog2.f32 %v81_v0  ;;  %v91_v2 = vsub.f32 1.0, %v81_v0  ;;  %v92_v3 = vsub.f32 1.0, %v82_v1 }
   0x3   :  { %7 = vsyncpa [#allocation4], 0  ;;  %185 = vlog2.f32 %v82_v1  ;;  %v83_v5 = vld [vmem:[%s237_s1] sm:$0xff]  ;;  %v84_v7 = vld [vmem:[%s237_s1 + $0x8] sm:$0xff]  ;;  %s158_s17 = sshll.u32 %s238_s2, 4  ;;  %s205_s19 = smov [#allocation3]   ;;  %s159_s17 = int_to_ptr.hbm [resolvable:$true] %s158_s17 }
   0x4   :  { %187 = vlog2.f32 %v91_v2  ;;  %v101_v14 = vsub.f32 1.0, %v83_v5  ;;  %v102_v17 = vsub.f32 1.0, %v84_v7 }
   0x5   :  { %189 = vlog2.f32 %v92_v3 }
   0x8   :  { %v184_v4 = vpop.eup %183 }
   0x9   :  { %v186_v6 = vpop.eup %185  ;;  %v86_v8 = vmul.f32 0.6931472, %v184_v4 }
   0xa   :  { %v188_v9 = vpop.eup %187  ;;  %v88_v10 = vmul.f32 0.6931472, %v186_v6 }
   0xb   :  { %v190_v11 = vpop.eup %189  ;;  %v89_v12 = vmax.f32 %v86_v8, -100.0  ;;  %v94_v13 = vmul.f32 0.6931472, %v188_v9 }
   0xc   :  { %v90_v15 = vmax.f32 %v88_v10, -100.0  ;;  %v96_v16 = vmul.f32 0.6931472, %v190_v11 }
   0xd   :  { %v97_v18 = vmax.f32 %v94_v13, -100.0  ;;  %v99_v19 = vmul.f32 %v89_v12, %v83_v5 }
   0xe   :  { %v98_v20 = vmax.f32 %v96_v16, -100.0  ;;  %v100_v21 = vmul.f32 %v90_v15, %v84_v7 }
   0xf   :  { %v103_v22 = vmul.f32 %v101_v14, %v97_v18 }
  0x10   :  { %v104_v23 = vmul.f32 %v102_v17, %v98_v20 }
  0x11   :  { %v105_v24 = vadd.f32 %v103_v22, %v99_v19 }
  0x12   :  { %v106_v25 = vadd.f32 %v104_v23, %v100_v21 }
  0x13   :  { %v107_v26 = vsub.f32 0.0, %v105_v24 }
  0x14   :  { %v108_v27 = vsub.f32 0.0, %v106_v25 }
  0x16   :  { %v117_v28 = vadd.f32 %v108_v27, %v107_v26 }
  0x18   :  { %142 = vadd.xlane.f32.xlu0 %v117_v28 }
  0x8b   :  { %v143_v29 = vpop.xlane.xlu0 %142 }
  0x8c   :  { %v144_v30 = vrot.slane %v143_v29, 4 }
  0x8e   :  { %v145_v31 = vadd.f32 %v144_v30, %v143_v29 }
  0x90   :  { %v146_v32 = vrot.slane %v145_v31, 2 }
  0x92   :  { %v147_v33 = vadd.f32 %v146_v32, %v145_v31 }
  0x94   :  { %v148_v34 = vrot.slane %v147_v33, 1 }
  0x96   :  { %v149_v35 = vadd.f32 %v148_v34, %v147_v33 }
  0x98   :  { %180 = vpush %v149_v35 }
  0xc9   :  { %s181_s18 = spop %180 }
  0xca   :  { %152 = sst [smem:[#allocation3]] %s181_s18 }
  0xcb   :  { %161 = dma.smem_to_hbm %s205_s19, 16, %s159_s17, [#allocation4]  }
  0xcc   :  { %203 = dma.done.wait [#allocation4], 16  }
  0xcd   :  { %204 = vsyncadd [#allocation4], 4294967280 }
  0xce   :  { %166 = sfence }
  0xcf   :  { %167 = vsyncpa [#allocation4], 1 }

</bundles_post_ra>
